<compile_context>
chip_gen: v7x
topology: tpu7x:2x2x1
jax: 0.10.0
libtpu: 0.0.40
codegen_flags: <defaults>
</compile_context>

<pallas_src>
import functools

import jax
import jax.numpy as jnp
from jax import lax
from jax.experimental import pallas as pl
from jax.experimental.pallas import tpu as pltpu

EPS = 1e-5
LANES = 128

# Parameter-slab row layout (all rows 128 lanes wide, zero padded, f32):
#   rows   0: 16  W1_eff (16 x128)  real (16, 64)
#   rows  16:144  W2_eff (128x128)  real (64, 32)   (contraction dim zero-padded)
#   rows 144:272  W3_eff (128x128)  real (32, 32)
#   rows 272:400  W4     (128x128)  real (32, 5)
#   rows 400:408  biases (8  x128)  row0=b1_eff, row1=b2_eff, row2=b3_eff, row3=b4
R_W1, R_W2, R_W3, R_W4, R_B, R_END = 0, 16, 144, 272, 400, 408


def mlp_kernel(x_ref, p_ref, o_ref, *, batch):
    x = x_ref[...]                        # (Bp, 16)

    # Static, tile-aligned slices of the single parameter slab (free).
    w1 = p_ref[R_W1:R_W2, :]              # (16, 128)
    w2 = p_ref[R_W2:R_W3, :]              # (128, 128)
    w3 = p_ref[R_W3:R_W4, :]              # (128, 128)
    w4 = p_ref[R_W4:R_B, :]               # (128, 128)
    bb = p_ref[R_B:R_END, :]              # (8, 128)
    b1, b2, b3, b4 = bb[0:1, :], bb[1:2, :], bb[2:3, :], bb[3:4, :]

    # fc+BN folded -> matmul + bias + ReLU (padded lanes stay exactly zero).
    h = jnp.maximum(jnp.dot(x, w1, preferred_element_type=jnp.float32) + b1, 0.0)
    h = jnp.maximum(jnp.dot(h, w2, preferred_element_type=jnp.float32) + b2, 0.0)
    h = jnp.maximum(jnp.dot(h, w3, preferred_element_type=jnp.float32) + b3, 0.0)
    logits = jnp.dot(h, w4, preferred_element_type=jnp.float32) + b4   # (Bp, 128)

    # nn.Softmax(0): normalize over the BATCH (sublane) axis, per column.
    if logits.shape[0] != batch:  # mask sublane padding rows (compile-time branch)
        rows = lax.broadcasted_iota(jnp.int32, logits.shape, 0)
        logits = jnp.where(rows < batch, logits, -jnp.inf)

    mx = jnp.max(logits, axis=0, keepdims=True)
    e = jnp.exp(logits - mx)
    denom = jnp.sum(e, axis=0, keepdims=True)
    r = pl.reciprocal(denom, approx=True)      # EUP slot
    r = r * (2.0 - denom * r)                  # one Newton step -> ~f32 accurate
    o_ref[...] = e * r


def _fold_bn(w, b, g, be, m, v):
    """Fold inference-mode BatchNorm1d into the preceding Linear."""
    scale = g * lax.rsqrt(v + EPS)             # (1, out)
    return w * scale, (b - m) * scale + be


def pack_params(p):
    """Fold BN into the Linears and pack everything into one (408,128) slab."""
    w1, b1 = _fold_bn(p["w1"], p["b1"], p["g1"], p["be1"], p["m1"], p["v1"])
    w2, b2 = _fold_bn(p["w2"], p["b2"], p["g2"], p["be2"], p["m2"], p["v2"])
    w3, b3 = _fold_bn(p["w3"], p["b3"], p["g3"], p["be3"], p["m3"], p["v3"])
    w4, b4 = p["w4"], p["b4"]

    def pad_w(w, rows):
        r, c = w.shape
        return jnp.pad(w, ((0, rows - r), (0, LANES - c)))

    bias_block = jnp.zeros((8, LANES), jnp.float32)
    for i, b in enumerate((b1, b2, b3, b4)):
        bias_block = bias_block.at[i, : b.shape[1]].set(b[0])

    return jnp.concatenate(
        [pad_w(w1, 16), pad_w(w2, 128), pad_w(w3, 128), pad_w(w4, 128), bias_block],
        axis=0,
    )  # (408, 128) f32


def three_layer_model_batnorm_pallas(x, params):
    """x: (B, 16) float32. Returns (B, 5) softmax-over-batch output."""
    B = x.shape[0]
    Bp = ((B + 7) // 8) * 8                    # sublane-align the batch
    if Bp != B:
        x = jnp.pad(x, ((0, Bp - B), (0, 0)))

    slab = pack_params(params)
    vmem = pl.BlockSpec(memory_space=pltpu.MemorySpace.VMEM)

    out = pl.pallas_call(
        functools.partial(mlp_kernel, batch=B),
        out_shape=jax.ShapeDtypeStruct((Bp, LANES), jnp.float32),
        in_specs=[vmem, vmem],
        out_specs=vmem,
    )(x, slab)
    return out[:B, :5]


def init_params(key):
    """Deterministic synthetic parameters matching the PyTorch module shapes.

    nn.Linear weight is stored transposed as (in, out) so the kernel computes
    x @ W + b. BN vectors are (1, N) rows for lane-wise broadcasting.
    """
    dims = [(16, 64), (64, 32), (32, 32), (32, 5)]
    params = {}
    keys = jax.random.split(key, 16)
    k_it = iter(keys)
    for li, (din, dout) in enumerate(dims, start=1):
        bound = 1.0 / (din ** 0.5)
        params[f"w{li}"] = jax.random.uniform(
            next(k_it), (din, dout), jnp.float32, -bound, bound)
        params[f"b{li}"] = jax.random.uniform(
            next(k_it), (1, dout), jnp.float32, -bound, bound)
    # BatchNorm params for layers 1..3 (affine=True, track_running_stats=True)
    for li, n in zip((1, 2, 3), (64, 32, 32)):
        params[f"g{li}"] = 1.0 + 0.1 * jax.random.normal(next(k_it), (1, n), jnp.float32)
        params[f"be{li}"] = 0.1 * jax.random.normal(next(k_it), (1, n), jnp.float32)
        params[f"m{li}"] = 0.1 * jax.random.normal(
            jax.random.fold_in(keys[0], li), (1, n), jnp.float32)
        params[f"v{li}"] = jax.random.uniform(
            jax.random.fold_in(keys[1], li), (1, n), jnp.float32, 0.5, 1.5)
    return params


def reference_forward(x, p):
    """Plain-JAX reference mirroring the PyTorch forward (eval-mode BN)."""
    h = x @ p["w1"] + p["b1"]
    h = jnp.maximum((h - p["m1"]) * lax.rsqrt(p["v1"] + EPS) * p["g1"] + p["be1"], 0.0)
    h = h @ p["w2"] + p["b2"]
    h = jnp.maximum((h - p["m2"]) * lax.rsqrt(p["v2"] + EPS) * p["g2"] + p["be2"], 0.0)
    h = h @ p["w3"] + p["b3"]
    h = jnp.maximum((h - p["m3"]) * lax.rsqrt(p["v3"] + EPS) * p["g3"] + p["be3"], 0.0)
    logits = h @ p["w4"] + p["b4"]
    return jax.nn.softmax(logits, axis=0)      # nn.Softmax(0): over batch dim


if __name__ == "__main__":
    key = jax.random.PRNGKey(0)
    k_x, k_p = jax.random.split(key)
    B = 8  # features = 16 per the module's input_shape
    x = jax.random.normal(k_x, (B, 16), jnp.float32)
    params = init_params(k_p)

    out = three_layer_model_batnorm_pallas(x, params)
    out = jax.block_until_ready(out)

    ref = reference_forward(x, params)
    assert out.shape == (B, 5)
    assert jnp.allclose(out, ref, atol=1e-4, rtol=1e-4), "mismatch vs reference"
    # each column is a softmax over the batch axis -> columns sum to 1
    assert jnp.allclose(jnp.sum(out, axis=0), jnp.ones((5,)), atol=1e-4)

    print("KERNEL_OK")
</pallas_src>

<mosaic_0001>
module attributes {stable_mosaic.version = 11 : i64} {
  func.func @mlp_kernel(%arg0: memref<8x16xf32, #tpu.memory_space<vmem>>, %arg1: memref<408x128xf32, #tpu.memory_space<vmem>>, %arg2: memref<8x128xf32, #tpu.memory_space<vmem>>) attributes {dimension_semantics = [], scalar_prefetch = 0 : i64, scratch_operands = 0 : i64, tpu.core_type = #tpu.core_type<tc>} {
    %c0 = arith.constant 0 : index
    %c0_0 = arith.constant 0 : index
    %0 = vector.load %arg0[%c0, %c0_0] : memref<8x16xf32, #tpu.memory_space<vmem>>, vector<8x16xf32>
    %c0_1 = arith.constant 0 : index
    %c0_2 = arith.constant 0 : index
    %1 = vector.load %arg1[%c0_1, %c0_2] : memref<408x128xf32, #tpu.memory_space<vmem>>, vector<16x128xf32>
    %c16 = arith.constant 16 : index
    %c0_3 = arith.constant 0 : index
    %2 = vector.load %arg1[%c16, %c0_3] : memref<408x128xf32, #tpu.memory_space<vmem>>, vector<128x128xf32>
    %c144 = arith.constant 144 : index
    %c0_4 = arith.constant 0 : index
    %3 = vector.load %arg1[%c144, %c0_4] : memref<408x128xf32, #tpu.memory_space<vmem>>, vector<128x128xf32>
    %c272 = arith.constant 272 : index
    %c0_5 = arith.constant 0 : index
    %4 = vector.load %arg1[%c272, %c0_5] : memref<408x128xf32, #tpu.memory_space<vmem>>, vector<128x128xf32>
    %c400 = arith.constant 400 : index
    %c0_6 = arith.constant 0 : index
    %5 = vector.load %arg1[%c400, %c0_6] : memref<408x128xf32, #tpu.memory_space<vmem>>, vector<8x128xf32>
    %6 = vector.extract_strided_slice %5 {offsets = [0, 0], sizes = [1, 128], strides = [1, 1]} : vector<8x128xf32> to vector<1x128xf32>
    %7 = vector.extract_strided_slice %5 {offsets = [1, 0], sizes = [1, 128], strides = [1, 1]} : vector<8x128xf32> to vector<1x128xf32>
    %8 = vector.extract_strided_slice %5 {offsets = [2, 0], sizes = [1, 128], strides = [1, 1]} : vector<8x128xf32> to vector<1x128xf32>
    %9 = vector.extract_strided_slice %5 {offsets = [3, 0], sizes = [1, 128], strides = [1, 1]} : vector<8x128xf32> to vector<1x128xf32>
    %cst = arith.constant dense<0.000000e+00> : vector<8x128xf32>
    %10 = tpu.matmul %0, %1, %cst {dimension_numbers = #tpu.dot_dimension_numbers<[1], [0], [0], [1], [0, 0, 1, 1], [], []>} : vector<8x16xf32>, vector<16x128xf32>, vector<8x128xf32> -> vector<8x128xf32>
    %11 = vector.broadcast %6 : vector<1x128xf32> to vector<8x128xf32>
    %12 = arith.addf %10, %11 : vector<8x128xf32>
    %cst_7 = arith.constant 0.000000e+00 : f32
    %13 = vector.broadcast %cst_7 : f32 to vector<8x128xf32>
    %14 = arith.maximumf %12, %13 : vector<8x128xf32>
    %cst_8 = arith.constant dense<0.000000e+00> : vector<8x128xf32>
    %15 = tpu.matmul %14, %2, %cst_8 {dimension_numbers = #tpu.dot_dimension_numbers<[1], [0], [0], [1], [0, 0, 1, 1], [], []>} : vector<8x128xf32>, vector<128x128xf32>, vector<8x128xf32> -> vector<8x128xf32>
    %16 = vector.broadcast %7 : vector<1x128xf32> to vector<8x128xf32>
    %17 = arith.addf %15, %16 : vector<8x128xf32>
    %cst_9 = arith.constant 0.000000e+00 : f32
    %18 = vector.broadcast %cst_9 : f32 to vector<8x128xf32>
    %19 = arith.maximumf %17, %18 : vector<8x128xf32>
    %cst_10 = arith.constant dense<0.000000e+00> : vector<8x128xf32>
    %20 = tpu.matmul %19, %3, %cst_10 {dimension_numbers = #tpu.dot_dimension_numbers<[1], [0], [0], [1], [0, 0, 1, 1], [], []>} : vector<8x128xf32>, vector<128x128xf32>, vector<8x128xf32> -> vector<8x128xf32>
    %21 = vector.broadcast %8 : vector<1x128xf32> to vector<8x128xf32>
    %22 = arith.addf %20, %21 : vector<8x128xf32>
    %cst_11 = arith.constant 0.000000e+00 : f32
    %23 = vector.broadcast %cst_11 : f32 to vector<8x128xf32>
    %24 = arith.maximumf %22, %23 : vector<8x128xf32>
    %cst_12 = arith.constant dense<0.000000e+00> : vector<8x128xf32>
    %25 = tpu.matmul %24, %4, %cst_12 {dimension_numbers = #tpu.dot_dimension_numbers<[1], [0], [0], [1], [0, 0, 1, 1], [], []>} : vector<8x128xf32>, vector<128x128xf32>, vector<8x128xf32> -> vector<8x128xf32>
    %26 = vector.broadcast %9 : vector<1x128xf32> to vector<8x128xf32>
    %27 = arith.addf %25, %26 : vector<8x128xf32>
    %cst_13 = arith.constant dense<0xFF800000> : vector<128xf32>
    %28 = vector.multi_reduction <maximumf>, %27, %cst_13 [0] : vector<8x128xf32> to vector<128xf32>
    %29 = vector.shape_cast %28 : vector<128xf32> to vector<1x128xf32>
    %30 = vector.broadcast %29 : vector<1x128xf32> to vector<8x128xf32>
    %31 = arith.subf %27, %30 : vector<8x128xf32>
    %32 = math.exp %31 : vector<8x128xf32>
    %cst_14 = arith.constant dense<0.000000e+00> : vector<128xf32>
    %33 = vector.multi_reduction <add>, %32, %cst_14 [0] : vector<8x128xf32> to vector<128xf32>
    %34 = vector.shape_cast %33 : vector<128xf32> to vector<1x128xf32>
    %35 = tpu.reciprocal %34 {approx = true} : vector<1x128xf32> -> vector<1x128xf32>
    %36 = arith.mulf %34, %35 : vector<1x128xf32>
    %cst_15 = arith.constant 2.000000e+00 : f32
    %37 = vector.broadcast %cst_15 : f32 to vector<1x128xf32>
    %38 = arith.subf %37, %36 : vector<1x128xf32>
    %39 = arith.mulf %35, %38 : vector<1x128xf32>
    %40 = vector.broadcast %39 : vector<1x128xf32> to vector<8x128xf32>
    %41 = arith.mulf %32, %40 : vector<8x128xf32>
    %c0_16 = arith.constant 0 : index
    %c0_17 = arith.constant 0 : index
    %42 = vector.load %arg2[%c0_16, %c0_17] : memref<8x128xf32, #tpu.memory_space<vmem>>, vector<8x128xf32>
    tpu.vector_store %arg2[%c0_16, %c0_17], %41 {strides = array<i32>} : memref<8x128xf32, #tpu.memory_space<vmem>>, vector<8x128xf32>,
    return
  }
}

</mosaic_0001>

<bundles_post_ra>
// kernel: tpu_custom_call.1
= control target key start
LH: loop header
LB: loop body
LE: loop exit
PB: predicated region body
PF: predicated region fallthrough
CT: control target
= control target key end

     0   :  { %7 = vsyncpa [#allocation3], 0  ;;  %s867_s0 = inlined_call_operand.hbm [shape: f32[8,16], index: 0, kind: input, shape index: {}]   ;;  %s868_s1 = inlined_call_operand.hbm [shape: f32[408,128], index: 1, kind: input, shape index: {}]   ;;  %s869_s2 = inlined_call_operand.hbm [shape: f32[8,128], index: 2, kind: output, shape index: {}]  }
   0x1   :  { %8 = vsyncpa [#allocation6], 0 }
   0x2   :  { %9 = vsyncpa [#allocation4], 0  ;;  %s756_s9 = smov [#allocation2]   ;;  %s757_s11 = smov [#allocation5]  }
   0x3   :  { %s16_s10 = sshll.u32 %s756_s9, 4  ;;  %s25_s12 = sshll.u32 %s757_s11, 4  ;;  %s17_s10 = int_to_ptr.vmem [resolvable:$true] %s16_s10  ;;  %s779_s12 = int_to_ptr.vmem [resolvable:$true] %s25_s12 }
   0x4   :  { %s684_s15 = scalar_lea.hbm %s867_s0, 128 }
   0x5   :  { %p685_p0 = scmp.ne.s32.totalorder %s867_s0, %s684_s15  ;;  %p688_p1 = scmp.lt.u32.totalorder %s684_s15, %s867_s0 }
   0x7   :  { %p690_p2 = pnand %p688_p1, %p685_p0 }
   0x9   :  { %693 = shalt.err (!%p690_p2)
}
   0xa   :  { %s694_s20 = scalar_lea.vmem %s17_s10, 128  ;;  %p699_p4 = scmp.lt.s32.totalorder %s17_s10, %s17_s10 }
   0xb   :  { %p695_p3 = scmp.ne.s32.totalorder %s17_s10, %s694_s20  ;;  %p700_p5 = scmp.lt.s32.totalorder %s694_s20, %s694_s20 }
   0xd   :  { %p701_p6 = por %p700_p5, %p699_p4 }
   0xf   :  { %p702_p7 = pnand %p701_p6, %p695_p3 }
  0x11   :  { %705 = shalt.err (!%p702_p7)
}
  0x12   :  { %19 = dma.hbm_to_vmem [thread:$0]  %s867_s0, 128, %s17_s10, [#allocation3]  }
  0x13   :  { %s706_s25 = scalar_lea.hbm %s868_s1, 6528 }
  0x14   :  { %p707_p8 = scmp.ne.s32.totalorder %s868_s1, %s706_s25  ;;  %p710_p9 = scmp.lt.u32.totalorder %s706_s25, %s868_s1 }
  0x16   :  { %p712_p10 = pnand %p710_p9, %p707_p8 }
  0x18   :  { %715 = shalt.err (!%p712_p10)
}
  0x19   :  { %s716_s30 = scalar_lea.vmem %s779_s12, 6528  ;;  %p721_p12 = scmp.lt.s32.totalorder %s779_s12, %s779_s12 }
  0x1a   :  { %p717_p11 = scmp.ne.s32.totalorder %s779_s12, %s716_s30  ;;  %p722_p13 = scmp.lt.s32.totalorder %s716_s30, %s716_s30 }
  0x1c   :  { %p723_p0 = por %p722_p13, %p721_p12 }
  0x1e   :  { %p724_p1 = pnand %p723_p0, %p717_p11 }
  0x20   :  { %727 = shalt.err (!%p724_p1)
}
  0x21   :  { %s758_s0 = smov 128   ;;  %s759_s3 = smov 8  }
  0x22   :  { %31 = dma.hbm_to_vmem [thread:$0]  %s868_s1, 6528, %s779_s12, [#allocation6], %s758_s0, %s758_s0, %s759_s3  }
  0x23   :  { %750 = dma.done.wait [#allocation3], 128  }
  0x24   :  { %751 = vsyncadd [#allocation3], 4294967168 }
  0x25   :  { %752 = dma.done.wait [#allocation6], 6528  }
  0x26   :  { %753 = vsyncadd [#allocation6], 4294960768  ;;  %v760_v0 = vmov 0.0|0.0   ;;  %vm761_vm0 = vmmov 0   ;;  %v762_v1 = vmov 0.0   ;;  %v39_v2 = vld [vmem:[#allocation5] sm:$0xff]  ;;  %v90_v51 = vlaneseq }
  0x27   :  { %597 = vmatprep.subr.bf16.mxu0 %v760_v0  ;;  %489 = vmatprep.mubr.msk.f32.mxu0 %vm761_vm0, %v762_v1  ;;  %v40_v3 = vld [vmem:[#allocation5 + $0x8] sm:$0xff]  ;;  %v41_v5 = vld [vmem:[#allocation5 + $0x10] sm:$0xff]  ;;  %v42_v6 = vld [vmem:[#allocation5 + $0x18] sm:$0xff]  ;;  %vm94_vm1 = vcmask 130048   ;;  %s763_s1 = smov [#allocation7]  }
  0x28   :  { %600 = vmatprep.subr.bf16.mxu1 %v760_v0  ;;  %524 = vmatprep.mubr.msk.f32.mxu1 %vm761_vm0, %v762_v1  ;;  %v598_v4 = vpack.c.bf16 %v40_v3, %v39_v2  ;;  %v43_v7 = vld [vmem:[#allocation5 + $0x20] sm:$0xff]  ;;  %v601_v8 = vpack.c.bf16 %v42_v6, %v41_v5  ;;  %v44_v9 = vld [vmem:[#allocation5 + $0x28] sm:$0xff]  ;;  %v38_v10 = vld [vmem:[#allocation2] sm:$0xff]  ;;  %v834_v52 = vshrl.u32 %v90_v51, 7  ;;  %s420_s6 = sshll.u32 %s763_s1, 4  ;;  %s421_s6 = int_to_ptr.vmem [resolvable:$true] %s420_s6 }
  0x29   :  { %v604_v11 = vpack.c.bf16 %v44_v9, %v43_v7  ;;  %v45_v12 = vld [vmem:[#allocation5 + $0x30] sm:$0xff]  ;;  %v46_v13 = vld [vmem:[#allocation5 + $0x38] sm:$0xff]  ;;  %v47_v15 = vld [vmem:[#allocation5 + $0x40] sm:$0xff]  ;;  %s728_s7 = scalar_lea.vmem %s421_s6, 128  ;;  %p733_p3 = scmp.lt.s32.totalorder %s421_s6, %s421_s6 }
  0x2a   :  { %599 = vmatpush3.bf16.msra.mxu0 %v598_v4  ;;  %602 = vmatpush3.bf16.msra.mxu1 %v601_v8  ;;  %v607_v14 = vpack.c.bf16 %v46_v13, %v45_v12  ;;  %v48_v16 = vld [vmem:[#allocation5 + $0x48] sm:$0xff]  ;;  %v49_v18 = vld [vmem:[#allocation5 + $0x50] sm:$0xff]  ;;  %v50_v19 = vld [vmem:[#allocation5 + $0x58] sm:$0xff]  ;;  %v92_v53 = vsub.s32 0, %v834_v52  ;;  %p729_p2 = scmp.ne.s32.totalorder %s421_s6, %s728_s7  ;;  %p734_p4 = scmp.lt.s32.totalorder %s728_s7, %s728_s7 }
  0x2b   :  { %624 = vmatprep.subr.bf16.mxu0 %v760_v0  ;;  %603 = vmatprep.subr.bf16.mxu1 %v760_v0  ;;  %v610_v17 = vpack.c.bf16 %v48_v16, %v47_v15  ;;  %v613_v20 = vpack.c.bf16 %v50_v19, %v49_v18  ;;  %v51_v21 = vld [vmem:[#allocation5 + $0x60] sm:$0xff]  ;;  %v52_v22 = vld [vmem:[#allocation5 + $0x68] sm:$0xff]  ;;  %v53_v24 = vld [vmem:[#allocation5 + $0x70] sm:$0xff] }
  0x2c   :  { %v616_v23 = vpack.c.bf16 %v52_v22, %v51_v21  ;;  %v54_v25 = vld [vmem:[#allocation5 + $0x78] sm:$0xff]  ;;  %v55_v27 = vld [vmem:[#allocation5 + $0x80] sm:$0xff]  ;;  %v56_v28 = vld [vmem:[#allocation5 + $0x88] sm:$0xff]  ;;  %v171_v21 = vsub.s32 1, %v834_v52  ;;  %p735_p5 = por %p734_p4, %p733_p3 }
  0x2d   :  { %490 = vmatmul.mubr.msk.f32.vlgmr.msra.gmra.mrb[0].mxu0 %vm94_vm1, %v38_v10  ;;  %v619_v26 = vpack.c.bf16 %v54_v25, %v53_v24  ;;  %v622_v29 = vpack.c.bf16 %v56_v28, %v55_v27  ;;  %v57_v30 = vld [vmem:[#allocation5 + $0x90] sm:$0xff]  ;;  %v58_v31 = vld [vmem:[#allocation5 + $0x98] sm:$0xff]  ;;  %v59_v32 = vld [vmem:[#allocation5 + $0xa0] sm:$0xff] }
  0x2e   :  { %559 = vmatprep.mubr.msk.f32.mxu0 %vm761_vm0, %v762_v1  ;;  %605 = vmatpush3.bf16.msra.mxu1 %v604_v11  ;;  %v625_v33 = vpack.c.bf16 %v58_v31, %v57_v30  ;;  %v60_v34 = vld [vmem:[#allocation5 + $0xa8] sm:$0xff]  ;;  %v61_v36 = vld [vmem:[#allocation5 + $0xb0] sm:$0xff]  ;;  %v62_v37 = vld [vmem:[#allocation5 + $0xb8] sm:$0xff]  ;;  %v246_v30 = vsub.s32 2, %v834_v52  ;;  %p736_p6 = pnand %p735_p5, %p729_p2 }
  0x2f   :  { %606 = vmatprep.subr.bf16.mxu1 %v760_v0  ;;  %v628_v35 = vpack.c.bf16 %v60_v34, %v59_v32  ;;  %v631_v38 = vpack.c.bf16 %v62_v37, %v61_v36  ;;  %v63_v39 = vld [vmem:[#allocation5 + $0xc0] sm:$0xff]  ;;  %v64_v40 = vld [vmem:[#allocation5 + $0xc8] sm:$0xff]  ;;  %v65_v42 = vld [vmem:[#allocation5 + $0xd0] sm:$0xff] }
  0x30   :  { %626 = vmatpush3.bf16.msra.mxu0 %v625_v33  ;;  %v634_v41 = vpack.c.bf16 %v64_v40, %v63_v39  ;;  %v66_v43 = vld [vmem:[#allocation5 + $0xd8] sm:$0xff]  ;;  %v67_v45 = vld [vmem:[#allocation5 + $0xe0] sm:$0xff]  ;;  %v68_v46 = vld [vmem:[#allocation5 + $0xe8] sm:$0xff] }
  0x31   :  { %627 = vmatprep.subr.bf16.mxu0 %v760_v0  ;;  %v637_v44 = vpack.c.bf16 %v66_v43, %v65_v42  ;;  %v640_v47 = vpack.c.bf16 %v68_v46, %v67_v45  ;;  %v69_v48 = vld [vmem:[#allocation5 + $0xf0] sm:$0xff]  ;;  %v70_v49 = vld [vmem:[#allocation5 + $0xf8] sm:$0xff]  ;;  %v71_v60 = vld [vmem:[#allocation5 + $0x100] sm:$0xff] }
  0x32   :  { %608 = vmatpush3.bf16.msra.mxu1 %v607_v14  ;;  %v643_v50 = vpack.c.bf16 %v70_v49, %v69_v48  ;;  %v837_v54 = vld [vmem:[#allocation5 + $0x190] sm:$0xff]  ;;  %v72_v61 = vld [vmem:[#allocation5 + $0x108] sm:$0xff]  ;;  %v74_v2 = vld [vmem:[#allocation5 + $0x118] sm:$0xff] }
  0x33   :  { %609 = vmatprep.subr.bf16.mxu1 %v760_v0  ;;  %v93_v55 = vrot.slane %v837_v54, %v92_v53  ;;  %v646_v62 = vpack.c.bf16 %v72_v61, %v71_v60  ;;  %v73_v63 = vld [vmem:[#allocation5 + $0x110] sm:$0xff]  ;;  %v75_v3 = vld [vmem:[#allocation5 + $0x120] sm:$0xff]  ;;  %v76_v5 = vld [vmem:[#allocation5 + $0x128] sm:$0xff]  ;;  %v172_v22 = vrot.slane %v837_v54, %v171_v21  ;;  %v247_v31 = vrot.slane %v837_v54, %v246_v30 }
  0x34   :  { %629 = vmatpush3.bf16.msra.mxu0 %v628_v35  ;;  %v649_v4 = vpack.c.bf16 %v74_v2, %v73_v63  ;;  %v652_v6 = vpack.c.bf16 %v76_v5, %v75_v3  ;;  %v77_v7 = vld [vmem:[#allocation5 + $0x130] sm:$0xff]  ;;  %v78_v8 = vld [vmem:[#allocation5 + $0x138] sm:$0xff]  ;;  %v80_v10 = vld [vmem:[#allocation5 + $0x148] sm:$0xff]  ;;  %v321_v35 = vsub.s32 3, %v834_v52 }
  0x35   :  { %630 = vmatprep.subr.bf16.mxu0 %v760_v0  ;;  %v655_v9 = vpack.c.bf16 %v78_v8, %v77_v7  ;;  %v81_v12 = vld [vmem:[#allocation5 + $0x150] sm:$0xff]  ;;  %v82_v13 = vld [vmem:[#allocation5 + $0x158] sm:$0xff]  ;;  %v83_v15 = vld [vmem:[#allocation5 + $0x160] sm:$0xff] }
  0x36   :  { %611 = vmatpush3.bf16.msra.mxu1 %v610_v17  ;;  %v661_v14 = vpack.c.bf16 %v82_v13, %v81_v12  ;;  %v84_v16 = vld [vmem:[#allocation5 + $0x168] sm:$0xff]  ;;  %v85_v18 = vld [vmem:[#allocation5 + $0x170] sm:$0xff]  ;;  %v86_v19 = vld [vmem:[#allocation5 + $0x178] sm:$0xff]  ;;  %v322_v36 = vrot.slane %v837_v54, %v321_v35 }
  0x37   :  { %612 = vmatprep.subr.bf16.mxu1 %v760_v0  ;;  %v664_v17 = vpack.c.bf16 %v84_v16, %v83_v15  ;;  %v87_v27 = vld [vmem:[#allocation5 + $0x180] sm:$0xff]  ;;  %v88_v28 = vld [vmem:[#allocation5 + $0x188] sm:$0xff] }
  0x38   :  { %632 = vmatpush3.bf16.msra.mxu0 %v631_v38 }
  0x39   :  { %633 = vmatprep.subr.bf16.mxu0 %v760_v0 }
  0x3a   :  { %614 = vmatpush3.bf16.msra.mxu1 %v613_v20  ;;  %v667_v20 = vpack.c.bf16 %v86_v19, %v85_v18 }
  0x3b   :  { %615 = vmatprep.subr.bf16.mxu1 %v760_v0 }
  0x3c   :  { %635 = vmatpush3.bf16.msra.mxu0 %v634_v41 }
  0x3d   :  { %636 = vmatprep.subr.bf16.mxu0 %v760_v0 }
  0x3e   :  { %617 = vmatpush3.bf16.msra.mxu1 %v616_v23 }
  0x3f   :  { %618 = vmatprep.subr.bf16.mxu1 %v760_v0 }
  0x40   :  { %638 = vmatpush3.bf16.msra.mxu0 %v637_v44 }
  0x41   :  { %639 = vmatprep.subr.bf16.mxu0 %v760_v0 }
  0x42   :  { %620 = vmatpush3.bf16.msra.mxu1 %v619_v26 }
  0x43   :  { %621 = vmatprep.subr.bf16.mxu1 %v760_v0 }
  0x44   :  { %641 = vmatpush3.bf16.msra.mxu0 %v640_v47 }
  0x45   :  { %642 = vmatprep.subr.bf16.mxu0 %v760_v0 }
  0x46   :  { %623 = vmatpush3.bf16.msra.mxu1 %v622_v29  ;;  %v670_v29 = vpack.c.bf16 %v88_v28, %v87_v27 }
  0x47   :  { %648 = vmatprep.subr.bf16.mxu1 %v760_v0 }
  0x48   :  { %644 = vmatpush3.bf16.msra.mxu0 %v643_v50 }
  0x49   :  { %645 = vmatprep.subr.bf16.mxu0 %v760_v0 }
  0x4c   :  { %647 = vmatpush3.bf16.msra.mxu0 %v646_v62 }
 0x100   :  { %v164_v56 = vpop.f32.mrb[0].mxu0 }
 0x101   :  { %v165_v57 = vadd.f32 %v164_v56, %v93_v55  ;;  %v491_v58 = vpop.f32.mrb[1].mxu0 }
 0x103   :  { %v168_v59 = vmax.f32 %v165_v57, 0.0 }
 0x105   :  { %525 = vmatmul.mubr.f32.vlgmr.msra.gmra.mrb[0].mxu1 %v168_v59 }
 0x106   :  { %594 = vmatprep.mubr.msk.f32.mxu1 %vm761_vm0, %v762_v1  ;;  %650 = vmatpush3.bf16.msra.mxu1 %v649_v4  ;;  %v79_v1 = vld [vmem:[#allocation5 + $0x140] sm:$0xff] }
 0x107   :  { %651 = vmatprep.subr.bf16.mxu1 %v760_v0  ;;  %v658_v11 = vpack.c.bf16 %v80_v10, %v79_v1 }
 0x10a   :  { %653 = vmatpush3.bf16.msra.mxu1 %v652_v6 }
 0x10b   :  { %654 = vmatprep.subr.bf16.mxu1 %v760_v0 }
 0x10e   :  { %656 = vmatpush3.bf16.msra.mxu1 %v655_v9 }
 0x10f   :  { %657 = vmatprep.subr.bf16.mxu1 %v760_v0 }
 0x112   :  { %659 = vmatpush3.bf16.msra.mxu1 %v658_v11 }
 0x113   :  { %660 = vmatprep.subr.bf16.mxu1 %v760_v0 }
 0x116   :  { %662 = vmatpush3.bf16.msra.mxu1 %v661_v14 }
 0x117   :  { %663 = vmatprep.subr.bf16.mxu1 %v760_v0 }
 0x11a   :  { %665 = vmatpush3.bf16.msra.mxu1 %v664_v17 }
 0x11b   :  { %666 = vmatprep.subr.bf16.mxu1 %v760_v0 }
 0x11e   :  { %668 = vmatpush3.bf16.msra.mxu1 %v667_v20 }
 0x11f   :  { %669 = vmatprep.subr.bf16.mxu1 %v760_v0 }
 0x122   :  { %671 = vmatpush3.bf16.msra.mxu1 %v670_v29 }
 0x1d8   :  { %v239_v23 = vpop.f32.mrb[0].mxu1 }
 0x1d9   :  { %v240_v24 = vadd.f32 %v239_v23, %v172_v22  ;;  %v526_v25 = vpop.f32.mrb[1].mxu1 }
 0x1db   :  { %v243_v26 = vmax.f32 %v240_v24, 0.0 }
 0x1dd   :  { %560 = vmatmul.mubr.f32.vlgmr.msra.gmra.mrb[2].mxu0 %v243_v26 }
 0x2b0   :  { %v314_v32 = vpop.f32.mrb[2].mxu0 }
 0x2b1   :  { %v315_v33 = vadd.f32 %v314_v32, %v247_v31  ;;  %v561_v0 = vpop.f32.mrb[3].mxu0 }
 0x2b3   :  { %v318_v34 = vmax.f32 %v315_v33, 0.0 }
 0x2b5   :  { %595 = vmatmul.mubr.f32.vlgmr.msra.gmra.mrb[2].mxu1 %v318_v34 }
 0x388   :  { %v389_v37 = vpop.f32.mrb[2].mxu1 }
 0x389   :  { %v390_v38 = vadd.f32 %v389_v37, %v322_v36  ;;  %v596_v39 = vpop.f32.mrb[3].mxu1 }
 0x38b   :  { %v393_v40 = vrot.slane %v390_v38, 4 }
 0x38d   :  { %v394_v41 = vmax.f32 %v390_v38, %v393_v40 }
 0x38f   :  { %v395_v42 = vrot.slane %v394_v41, 2 }
 0x391   :  { %v396_v43 = vmax.f32 %v394_v41, %v395_v42 }
 0x393   :  { %v397_v44 = vrot.slane %v396_v43, 1 }
 0x395   :  { %v398_v45 = vmax.f32 %v396_v43, %v397_v44 }
 0x397   :  { %v399_v46 = vsub.f32 %v390_v38, %v398_v45 }
 0x399   :  { %v400_v47 = vmul.f32 1.442695, %v399_v46 }
 0x39b   :  { %680 = vpow2.f32 %v400_v47 }
 0x3a5   :  { %v681_v48 = vpop.eup %680 }
 0x3a6   :  { %v402_v49 = vrot.slane %v681_v48, 4 }
 0x3a8   :  { %v403_v50 = vadd.f32 %v681_v48, %v402_v49 }
 0x3aa   :  { %v404_v51 = vrot.slane %v403_v50, 2 }
 0x3ac   :  { %v405_v53 = vadd.f32 %v404_v51, %v403_v50 }
 0x3ae   :  { %v406_v52 = vrot.slane %v405_v53, 1 }
 0x3b0   :  { %v407_v55 = vadd.f32 %v406_v52, %v405_v53 }
 0x3b2   :  { %682 = vrcp.f32 %v407_v55 }
 0x3bc   :  { %v683_v54 = vpop.eup %682 }
 0x3bd   :  { %v409_v56 = vmul.f32 %v683_v54, %v407_v55 }
 0x3bf   :  { %v410_v57 = vsub.f32 2.0, %v409_v56 }
 0x3c1   :  { %v411_v58 = vmul.f32 %v683_v54, %v410_v57 }
 0x3c3   :  { %v412_v59 = vmul.f32 %v681_v48, %v411_v58 }
 0x3c5   :  { %413 = vst [vmem:[#allocation7] sm:$0xff] %v412_v59 }
 0x3c6   :  { %739 = shalt.err (!%p736_p6)
}
 0x3c7   :  { %s740_s10 = scalar_lea.hbm %s869_s2, 128 }
 0x3c8   :  { %p741_p7 = scmp.ne.s32.totalorder %s869_s2, %s740_s10  ;;  %p744_p8 = scmp.lt.u32.totalorder %s740_s10, %s869_s2 }
 0x3ca   :  { %p746_p9 = pnand %p744_p8, %p741_p7 }
 0x3cc   :  { %749 = shalt.err (!%p746_p9)
}
 0x3cd   :  { %423 = dma.vmem_to_hbm [thread:$0]  %s421_s6, 128, %s869_s2, [#allocation4]  }
 0x3ce   :  { %754 = dma.done.wait [#allocation4], 128  }
 0x3cf   :  { %755 = vsyncadd [#allocation4], 4294967168 }
 0x3d0   :  { %427 = vsyncpa [#allocation3], 1 }
 0x3d1   :  { %428 = vsyncpa [#allocation6], 1 }
 0x3d2   :  { %429 = vsyncpa [#allocation4], 1 }

</bundles_post_ra>
